<compile_context>
chip_gen: v7x
topology: tpu7x:2x2x1
jax: 0.10.0
libtpu: 0.0.40
codegen_flags: <defaults>
</compile_context>

<pallas_src>
import functools

import jax
import jax.numpy as jnp
import numpy as np
from jax.experimental import pallas as pl
from jax.experimental.pallas import tpu as pltpu


def _round_up(x, m):
    return ((x + m - 1) // m) * m


FREEZE_BIAS = 1e6  # sigmoid(>=~100) == 1.0 in f32 -> exact hidden-state freeze


# ----------------------------------------------------------------------------
# Pallas kernel: masked GRU recurrence (bounded by max_len) + fused heads
# ----------------------------------------------------------------------------
def gru_encoder_kernel(
    max_len_ref,   # SMEM (1,)       int32  scalar-prefetched max(lengths)
    gx_ref,        # VMEM (T, BT, G) f32    gathered input projections (+freeze bias)
    whh_ref,       # VMEM (H, G)     f32    W_hh^T (gate order r|z|n), lane-padded
    bhhn_ref,      # VMEM (1, G)     f32    [0, 0, b_hn], lane-padded
    whead_ref,     # VMEM (H, O)     f32    fused [W_mean^T | W_logstd^T | W_h^T]
    bhead_ref,     # VMEM (1, O)     f32    fused [b_mean | b_logstd | b_h]
    out_ref,       # VMEM (BT, O)    f32    fused lane-dense output
    h_ref,         # VMEM (BT, H)    f32    scratch hidden state
    *,
    hidden,
):
    H = hidden
    whh = whh_ref[...]      # (H, G) loop-invariant
    bhh_n = bhhn_ref[...]   # (1, G)

    h_ref[...] = jnp.zeros_like(h_ref)
    n_steps = max_len_ref[0]

    # Serial GRU recurrence; runs only max(lengths) steps.  The pack_padded
    # "freeze" is already baked into gx (z-gate forced to 1 past each row's
    # length), so there is no mask work on the chain.
    # TODO(synk): stage W_hh once in the MXU weight registers
    #             (pltpu.matmul_push_rhs / matmul_acc_lhs / matmul_pop) to avoid
    #             re-pushing the loop-invariant RHS on every step.
    @pl.loop(0, n_steps)
    def _(t):
        h = h_ref[...]                                    # (BT, H)
        gx = gx_ref[t]                                    # (BT, G)
        gh = jnp.dot(h, whh, preferred_element_type=jnp.float32) + bhh_n
        r = jax.nn.sigmoid(gx[:, :H] + gh[:, :H])
        z = jax.nn.sigmoid(gx[:, H:2 * H] + gh[:, H:2 * H])
        n = jnp.tanh(gx[:, 2 * H:3 * H] + r * gh[:, 2 * H:3 * H])
        h_ref[...] = (1.0 - z) * n + z * h

    # Fused output heads: one matmul, one lane-dense full-vreg store.
    out_ref[...] = (
        jnp.dot(h_ref[...], whead_ref[...], preferred_element_type=jnp.float32)
        + bhead_ref[...]
    )


# ----------------------------------------------------------------------------
# Wrapper
# ----------------------------------------------------------------------------
def rnn_text_encoder_forward(tokens, lengths, params):
    """tokens: (B, T) int32, lengths: (B,) int32."""
    B, T = tokens.shape
    H = params["w_hh"].shape[1]
    D = params["w_mean"].shape[0]
    HD = params["w_h"].shape[0]

    BT = 8                              # batch tile (sublane multiple)
    Bp = _round_up(max(B, BT), BT)
    G = _round_up(3 * H, 128)           # gate lane tile
    O_raw = 2 * D + HD
    O = _round_up(O_raw, 128)           # fused-head lane tile

    # ---- pad batch; padded rows get length 0 (their hidden state stays 0)
    tokens_p = jnp.zeros((Bp, T), jnp.int32).at[:B, :].set(tokens.astype(jnp.int32))
    lengths_p = jnp.zeros((Bp,), jnp.int32).at[:B].set(lengths.astype(jnp.int32))
    max_len = jnp.max(lengths_p, keepdims=True).astype(jnp.int32)   # (1,) scalar prefetch

    # ---- fuse embedding + input projection into one small table, then gather.
    #      (r, z) hidden biases are folded into the table bias; only the n-gate
    #      hidden bias remains in the recurrence.
    w_ih_t = params["w_ih"].T.astype(jnp.float32)          # (E, 3H)
    b_ih = params["b_ih"].astype(jnp.float32)
    b_hh = params["b_hh"].astype(jnp.float32)
    b_fold = b_ih.at[:2 * H].add(b_hh[:2 * H])
    proj = params["emb_table"].astype(jnp.float32) @ w_ih_t + b_fold[None, :]  # (V, 3H)
    proj_p = jnp.pad(proj, ((0, 0), (0, G - 3 * H)))                           # (V, G)

    gx = proj_p[tokens_p.T]                                # (T, Bp, G) time-major gather
    # TODO(synk): for large T, tile gx over time chunks (pltpu.emit_pipeline) and/or
    #             gather proj_p in-kernel to respect v7x's 64 MiB VMEM.

    # ---- bake the pack_padded "freeze" into the z-gate: for t >= lengths[b],
    #      z = sigmoid(+1e6) == 1.0 so h_new == h exactly.
    t_idx = jnp.arange(T, dtype=jnp.int32)[:, None]                     # (T, 1)
    pad_mask = (t_idx >= lengths_p[None, :]).astype(jnp.float32)        # (T, Bp)
    z_lane = jnp.zeros((G,), jnp.float32).at[H:2 * H].set(1.0)          # (G,)
    gx = gx + (FREEZE_BIAS * pad_mask)[:, :, None] * z_lane[None, None, :]

    # ---- recurrent weights / n-gate hidden bias, lane-padded
    whh_p = jnp.pad(params["w_hh"].T.astype(jnp.float32), ((0, 0), (0, G - 3 * H)))  # (H, G)
    bhh_n = jnp.zeros((3 * H,), jnp.float32).at[2 * H:].set(b_hh[2 * H:])
    bhhn_p = jnp.pad(bhh_n, (0, G - 3 * H)).reshape(1, G)

    # ---- fused output heads: concat [mean | log_std | h], pad lanes to O
    w_heads = jnp.concatenate(
        [params["w_mean"].T, params["w_logstd"].T, params["w_h"].T], axis=1
    ).astype(jnp.float32)                                               # (H, O_raw)
    b_heads = jnp.concatenate(
        [params["b_mean"], params["b_logstd"], params["b_h"]]
    ).astype(jnp.float32)
    w_heads_p = jnp.pad(w_heads, ((0, 0), (0, O - O_raw)))
    b_heads_p = jnp.pad(b_heads, (0, O - O_raw)).reshape(1, O)

    grid_spec = pltpu.PrefetchScalarGridSpec(
        num_scalar_prefetch=1,
        grid=(Bp // BT,),                                  # batch tiles (parallel)
        in_specs=[
            pl.BlockSpec((T, BT, G), lambda i, ml: (0, i, 0)),   # gathered projections
            pl.BlockSpec((H, G), lambda i, ml: (0, 0)),          # W_hh^T
            pl.BlockSpec((1, G), lambda i, ml: (0, 0)),          # n-gate hidden bias
            pl.BlockSpec((H, O), lambda i, ml: (0, 0)),          # fused heads weight
            pl.BlockSpec((1, O), lambda i, ml: (0, 0)),          # fused heads bias
        ],
        out_specs=pl.BlockSpec((BT, O), lambda i, ml: (i, 0)),
        scratch_shapes=[pltpu.VMEM((BT, H), jnp.float32)],       # hidden state
    )

    out = pl.pallas_call(
        functools.partial(gru_encoder_kernel, hidden=H),
        out_shape=jax.ShapeDtypeStruct((Bp, O), jnp.float32),
        grid_spec=grid_spec,
        compiler_params=pltpu.CompilerParams(
            dimension_semantics=("parallel",),
        ),
    )(max_len, gx, whh_p, bhhn_p, w_heads_p, b_heads_p)

    mean = out[:B, :D]
    log_std = out[:B, D:2 * D]
    h = out[:B, 2 * D:2 * D + HD]
    return mean, log_std, h


# ----------------------------------------------------------------------------
# Pure-JAX reference (mirrors the PyTorch forward) for correctness checking
# ----------------------------------------------------------------------------
def reference_forward(tokens, lengths, params):
    B, T = tokens.shape
    H = params["w_hh"].shape[1]
    emb = params["emb_table"][tokens]  # (B, T, E)
    h = jnp.zeros((B, H), jnp.float32)
    for t in range(T):
        x_t = emb[:, t, :]
        gx = x_t @ params["w_ih"].T + params["b_ih"]
        gh = h @ params["w_hh"].T + params["b_hh"]
        r = jax.nn.sigmoid(gx[:, :H] + gh[:, :H])
        z = jax.nn.sigmoid(gx[:, H:2 * H] + gh[:, H:2 * H])
        n = jnp.tanh(gx[:, 2 * H:] + r * gh[:, 2 * H:])
        h_new = (1.0 - z) * n + z * h
        mask = (t < lengths)[:, None]
        h = jnp.where(mask, h_new, h)
    mean = h @ params["w_mean"].T + params["b_mean"]
    log_std = h @ params["w_logstd"].T + params["b_logstd"]
    h_out = h @ params["w_h"].T + params["b_h"]
    return mean, log_std, h_out


# ----------------------------------------------------------------------------
# Main
# ----------------------------------------------------------------------------
if __name__ == "__main__":
    # module hyperparameters (small)
    dim = 16
    vocab_size = 50
    embedding_size = 32
    hidden_size = 32
    h_dim = 8
    batch, seq_len = 4, 8

    key = jax.random.PRNGKey(0)
    keys = jax.random.split(key, 12)

    def init(k, shape, scale=0.1):
        return (scale * jax.random.normal(k, shape)).astype(jnp.float32)

    params = {
        "emb_table": init(keys[0], (vocab_size, embedding_size)),
        "w_ih": init(keys[1], (3 * hidden_size, embedding_size)),
        "w_hh": init(keys[2], (3 * hidden_size, hidden_size)),
        "b_ih": init(keys[3], (3 * hidden_size,)),
        "b_hh": init(keys[4], (3 * hidden_size,)),
        "w_mean": init(keys[5], (dim, hidden_size)),
        "b_mean": init(keys[6], (dim,)),
        "w_logstd": init(keys[7], (dim, hidden_size)),
        "b_logstd": init(keys[8], (dim,)),
        "w_h": init(keys[9], (h_dim, hidden_size)),
        "b_h": init(keys[10], (h_dim,)),
    }

    tokens = jax.random.randint(keys[11], (batch, seq_len), 0, vocab_size, dtype=jnp.int32)
    lengths = jnp.array([8, 3, 5, 1], dtype=jnp.int32)  # variable valid lengths

    mean, log_std, h = rnn_text_encoder_forward(tokens, lengths, params)
    jax.block_until_ready((mean, log_std, h))

    r_mean, r_log_std, r_h = reference_forward(tokens, lengths, params)
    np.testing.assert_allclose(np.asarray(mean), np.asarray(r_mean), atol=1e-5, rtol=1e-5)
    np.testing.assert_allclose(np.asarray(log_std), np.asarray(r_log_std), atol=1e-5, rtol=1e-5)
    np.testing.assert_allclose(np.asarray(h), np.asarray(r_h), atol=1e-5, rtol=1e-5)

    print("KERNEL_OK")
</pallas_src>

<mosaic_0001>
module attributes {stable_mosaic.version = 11 : i64} {
  func.func @gru_encoder_kernel(%arg0: i32, %arg1: memref<1xi32, #tpu.memory_space<smem>>, %arg2: memref<8x8x128xf32, #tpu.memory_space<vmem>>, %arg3: memref<32x128xf32, #tpu.memory_space<vmem>>, %arg4: memref<1x128xf32, #tpu.memory_space<vmem>>, %arg5: memref<32x128xf32, #tpu.memory_space<vmem>>, %arg6: memref<1x128xf32, #tpu.memory_space<vmem>>, %arg7: memref<8x128xf32, #tpu.memory_space<vmem>>, %arg8: memref<8x32xf32, #tpu.memory_space<vmem>>) attributes {dimension_semantics = [#tpu.dimension_semantics<parallel>], iteration_bounds = array<i64: 1>, scalar_prefetch = 1 : i64, scratch_operands = 1 : i64, tpu.core_type = #tpu.core_type<tc>, window_params = [{transform_indices = @transform_0, window_bounds = array<i64: 8, 8, 128>}, {pipeline_mode = #tpu.pipeline_mode<synchronous>, transform_indices = @transform_1, window_bounds = array<i64: 32, 128>}, {pipeline_mode = #tpu.pipeline_mode<synchronous>, transform_indices = @transform_2, window_bounds = array<i64: 1, 128>}, {pipeline_mode = #tpu.pipeline_mode<synchronous>, transform_indices = @transform_3, window_bounds = array<i64: 32, 128>}, {pipeline_mode = #tpu.pipeline_mode<synchronous>, transform_indices = @transform_4, window_bounds = array<i64: 1, 128>}, {transform_indices = @transform_5, window_bounds = array<i64: 8, 128>}]} {
    %c0 = arith.constant 0 : index
    %c0_0 = arith.constant 0 : index
    %0 = vector.load %arg3[%c0, %c0_0] : memref<32x128xf32, #tpu.memory_space<vmem>>, vector<32x128xf32>
    %c0_1 = arith.constant 0 : index
    %c0_2 = arith.constant 0 : index
    %1 = vector.load %arg4[%c0_1, %c0_2] : memref<1x128xf32, #tpu.memory_space<vmem>>, vector<1x128xf32>
    %cst = arith.constant 0.000000e+00 : f32
    %2 = vector.broadcast %cst : f32 to vector<8x32xf32>
    %c0_3 = arith.constant 0 : index
    %c0_4 = arith.constant 0 : index
    %3 = vector.load %arg8[%c0_3, %c0_4] : memref<8x32xf32, #tpu.memory_space<vmem>>, vector<8x32xf32>
    tpu.vector_store %arg8[%c0_3, %c0_4], %2 {strides = array<i32>} : memref<8x32xf32, #tpu.memory_space<vmem>>, vector<8x32xf32>,
    %c0_5 = arith.constant 0 : index
    %4 = memref.load %arg1[%c0_5] : memref<1xi32, #tpu.memory_space<smem>>
    %c0_i32 = arith.constant 0 : i32
    %5 = arith.subi %4, %c0_i32 : i32
    %c1_i32 = arith.constant 1 : i32
    %c1_i32_6 = arith.constant 1 : i32
    %6 = arith.subi %c1_i32, %c1_i32_6 : i32
    %7 = arith.addi %5, %6 : i32
    %c1_i32_7 = arith.constant 1 : i32
    %8 = arith.divsi %7, %c1_i32_7 : i32
    %c1_i32_8 = arith.constant 1 : i32
    %c0_i32_9 = arith.constant 0 : i32
    %c0_i32_10 = arith.constant 0 : i32
    %9 = arith.subi %8, %c0_i32_10 : i32
    %10 = arith.addi %c0_i32_10, %9 : i32
    %c1_i32_11 = arith.constant 1 : i32
    scf.for %arg9 = %c0_i32_10 to %10 step %c1_i32_11  : i32 {
      %18 = arith.muli %arg9, %c1_i32_8 : i32
      %19 = arith.addi %c0_i32_9, %18 : i32
      %c0_21 = arith.constant 0 : index
      %c0_22 = arith.constant 0 : index
      %20 = vector.load %arg8[%c0_21, %c0_22] : memref<8x32xf32, #tpu.memory_space<vmem>>, vector<8x32xf32>
      %21 = arith.index_cast %19 : i32 to index
      %c0_23 = arith.constant 0 : index
      %c0_24 = arith.constant 0 : index
      %22 = vector.load %arg2[%21, %c0_23, %c0_24] : memref<8x8x128xf32, #tpu.memory_space<vmem>>, vector<1x8x128xf32>
      %23 = vector.shape_cast %22 : vector<1x8x128xf32> to vector<8x128xf32>
      %cst_25 = arith.constant dense<0.000000e+00> : vector<8x128xf32>
      %24 = tpu.matmul %20, %0, %cst_25 {dimension_numbers = #tpu.dot_dimension_numbers<[1], [0], [0], [1], [0, 0, 1, 1], [], []>} : vector<8x32xf32>, vector<32x128xf32>, vector<8x128xf32> -> vector<8x128xf32>
      %25 = vector.broadcast %1 : vector<1x128xf32> to vector<8x128xf32>
      %26 = arith.addf %24, %25 : vector<8x128xf32>
      %27 = vector.extract_strided_slice %23 {offsets = [0, 0], sizes = [8, 32], strides = [1, 1]} : vector<8x128xf32> to vector<8x32xf32>
      %28 = vector.extract_strided_slice %26 {offsets = [0, 0], sizes = [8, 32], strides = [1, 1]} : vector<8x128xf32> to vector<8x32xf32>
      %29 = arith.addf %27, %28 : vector<8x32xf32>
      %30 = arith.negf %29 : vector<8x32xf32>
      %31 = math.exp %30 : vector<8x32xf32>
      %cst_26 = arith.constant 1.000000e+00 : f32
      %32 = vector.broadcast %cst_26 : f32 to vector<8x32xf32>
      %33 = arith.addf %32, %31 : vector<8x32xf32>
      %34 = arith.divf %32, %33 : vector<8x32xf32>
      %35 = vector.extract_strided_slice %23 {offsets = [0, 32], sizes = [8, 32], strides = [1, 1]} : vector<8x128xf32> to vector<8x32xf32>
      %36 = vector.extract_strided_slice %26 {offsets = [0, 32], sizes = [8, 32], strides = [1, 1]} : vector<8x128xf32> to vector<8x32xf32>
      %37 = arith.addf %35, %36 : vector<8x32xf32>
      %38 = arith.negf %37 : vector<8x32xf32>
      %39 = math.exp %38 : vector<8x32xf32>
      %cst_27 = arith.constant 1.000000e+00 : f32
      %40 = vector.broadcast %cst_27 : f32 to vector<8x32xf32>
      %41 = arith.addf %40, %39 : vector<8x32xf32>
      %42 = arith.divf %40, %41 : vector<8x32xf32>
      %43 = vector.extract_strided_slice %23 {offsets = [0, 64], sizes = [8, 32], strides = [1, 1]} : vector<8x128xf32> to vector<8x32xf32>
      %44 = vector.extract_strided_slice %26 {offsets = [0, 64], sizes = [8, 32], strides = [1, 1]} : vector<8x128xf32> to vector<8x32xf32>
      %45 = arith.mulf %34, %44 : vector<8x32xf32>
      %46 = arith.addf %43, %45 : vector<8x32xf32>
      %47 = math.tanh %46 : vector<8x32xf32>
      %cst_28 = arith.constant 1.000000e+00 : f32
      %48 = vector.broadcast %cst_28 : f32 to vector<8x32xf32>
      %49 = arith.subf %48, %42 : vector<8x32xf32>
      %50 = arith.mulf %49, %47 : vector<8x32xf32>
      %51 = arith.mulf %42, %20 : vector<8x32xf32>
      %52 = arith.addf %50, %51 : vector<8x32xf32>
      %c0_29 = arith.constant 0 : index
      %c0_30 = arith.constant 0 : index
      %53 = vector.load %arg8[%c0_29, %c0_30] : memref<8x32xf32, #tpu.memory_space<vmem>>, vector<8x32xf32>
      tpu.vector_store %arg8[%c0_29, %c0_30], %52 {strides = array<i32>} : memref<8x32xf32, #tpu.memory_space<vmem>>, vector<8x32xf32>,
    }
    %c0_12 = arith.constant 0 : index
    %c0_13 = arith.constant 0 : index
    %11 = vector.load %arg8[%c0_12, %c0_13] : memref<8x32xf32, #tpu.memory_space<vmem>>, vector<8x32xf32>
    %c0_14 = arith.constant 0 : index
    %c0_15 = arith.constant 0 : index
    %12 = vector.load %arg5[%c0_14, %c0_15] : memref<32x128xf32, #tpu.memory_space<vmem>>, vector<32x128xf32>
    %cst_16 = arith.constant dense<0.000000e+00> : vector<8x128xf32>
    %13 = tpu.matmul %11, %12, %cst_16 {dimension_numbers = #tpu.dot_dimension_numbers<[1], [0], [0], [1], [0, 0, 1, 1], [], []>} : vector<8x32xf32>, vector<32x128xf32>, vector<8x128xf32> -> vector<8x128xf32>
    %c0_17 = arith.constant 0 : index
    %c0_18 = arith.constant 0 : index
    %14 = vector.load %arg6[%c0_17, %c0_18] : memref<1x128xf32, #tpu.memory_space<vmem>>, vector<1x128xf32>
    %15 = vector.broadcast %14 : vector<1x128xf32> to vector<8x128xf32>
    %16 = arith.addf %13, %15 : vector<8x128xf32>
    %c0_19 = arith.constant 0 : index
    %c0_20 = arith.constant 0 : index
    %17 = vector.load %arg7[%c0_19, %c0_20] : memref<8x128xf32, #tpu.memory_space<vmem>>, vector<8x128xf32>
    tpu.vector_store %arg7[%c0_19, %c0_20], %16 {strides = array<i32>} : memref<8x128xf32, #tpu.memory_space<vmem>>, vector<8x128xf32>,
    return
  }
  func.func @transform_0(%arg0: i32, %arg1: memref<1xi32, #tpu.memory_space<smem>>) -> (i32, i32, i32) {
    %c0_i32 = arith.constant 0 : i32
    %c0_i32_0 = arith.constant 0 : i32
    %c0_i32_1 = arith.constant 0 : i32
    return %c0_i32, %arg0, %c0_i32_0 : i32, i32, i32
  }
  func.func @transform_1(%arg0: i32, %arg1: memref<1xi32, #tpu.memory_space<smem>>) -> (i32, i32) {
    %c0_i32 = arith.constant 0 : i32
    %c0_i32_0 = arith.constant 0 : i32
    %c0_i32_1 = arith.constant 0 : i32
    return %c0_i32, %c0_i32_0 : i32, i32
  }
  func.func @transform_2(%arg0: i32, %arg1: memref<1xi32, #tpu.memory_space<smem>>) -> (i32, i32) {
    %c0_i32 = arith.constant 0 : i32
    %c0_i32_0 = arith.constant 0 : i32
    %c0_i32_1 = arith.constant 0 : i32
    return %c0_i32, %c0_i32_0 : i32, i32
  }
  func.func @transform_3(%arg0: i32, %arg1: memref<1xi32, #tpu.memory_space<smem>>) -> (i32, i32) {
    %c0_i32 = arith.constant 0 : i32
    %c0_i32_0 = arith.constant 0 : i32
    %c0_i32_1 = arith.constant 0 : i32
    return %c0_i32, %c0_i32_0 : i32, i32
  }
  func.func @transform_4(%arg0: i32, %arg1: memref<1xi32, #tpu.memory_space<smem>>) -> (i32, i32) {
    %c0_i32 = arith.constant 0 : i32
    %c0_i32_0 = arith.constant 0 : i32
    %c0_i32_1 = arith.constant 0 : i32
    return %c0_i32, %c0_i32_0 : i32, i32
  }
  func.func @transform_5(%arg0: i32, %arg1: memref<1xi32, #tpu.memory_space<smem>>) -> (i32, i32) {
    %c0_i32 = arith.constant 0 : i32
    %c0_i32_0 = arith.constant 0 : i32
    return %arg0, %c0_i32 : i32, i32
  }
}

</mosaic_0001>

<bundles_post_ra>
// kernel: tpu_custom_call.1
= control target key start
LH: loop header
LB: loop body
LE: loop exit
PB: predicated region body
PF: predicated region fallthrough
CT: control target
= control target key end

     0   :  { %12 = vsyncpa [#allocation6], 0  ;;  %s627_s0 = inlined_call_operand.<no memory space> [shape: s32[1], index: 0, kind: input, shape index: {}]   ;;  %s628_s1 = inlined_call_operand.hbm [shape: f32[8,8,128], index: 1, kind: input, shape index: {}]   ;;  %s629_s2 = inlined_call_operand.hbm [shape: f32[32,128], index: 2, kind: input, shape index: {}]   ;;  %s630_s3 = inlined_call_operand.vmem [shape: f32[1,128], index: 3, kind: input, shape index: {}]   ;;  %s631_s4 = inlined_call_operand.hbm [shape: f32[32,128], index: 4, kind: input, shape index: {}]   ;;  %s632_s5 = inlined_call_operand.vmem [shape: f32[1,128], index: 5, kind: input, shape index: {}]   ;;  %s633_s6 = inlined_call_operand.hbm [shape: f32[8,128], index: 6, kind: output, shape index: {}]  }
   0x1   :  { %13 = vsyncpa [#allocation9], 0 }
   0x2   :  { %14 = vsyncpa [#allocation7], 0  ;;  %s486_s21 = smov [#allocation8]   ;;  %s487_s23 = smov [#allocation5]  }
   0x3   :  { %s32_s22 = sshll.u32 %s486_s21, 4  ;;  %s20_s24 = sshll.u32 %s487_s23, 4  ;;  %s33_s22 = int_to_ptr.vmem [resolvable:$true] %s32_s22  ;;  %s536_s24 = int_to_ptr.vmem [resolvable:$true] %s20_s24 }
   0x4   :  { %s384_s27 = scalar_lea.hbm %s629_s2, 512 }
   0x5   :  { %p385_p0 = scmp.ne.s32.totalorder %s629_s2, %s384_s27  ;;  %p388_p1 = scmp.lt.u32.totalorder %s384_s27, %s629_s2 }
   0x7   :  { %p390_p2 = pnand %p388_p1, %p385_p0 }
   0x9   :  { %393 = shalt.err (!%p390_p2)
}
   0xa   :  { %s394_s8 = scalar_lea.vmem %s33_s22, 512  ;;  %p399_p4 = scmp.lt.s32.totalorder %s33_s22, %s33_s22 }
   0xb   :  { %p395_p3 = scmp.ne.s32.totalorder %s33_s22, %s394_s8  ;;  %p400_p5 = scmp.lt.s32.totalorder %s394_s8, %s394_s8 }
   0xd   :  { %p401_p6 = por %p400_p5, %p399_p4 }
   0xf   :  { %p402_p7 = pnand %p401_p6, %p395_p3 }
  0x11   :  { %405 = shalt.err (!%p402_p7)
}
  0x12   :  { %s488_s9 = smov 128   ;;  %s489_s10 = smov 8  }
  0x13   :  { %38 = dma.hbm_to_vmem [thread:$0]  %s629_s2, 512, %s33_s22, [#allocation9], %s488_s9, %s488_s9, %s489_s10  }
  0x14   :  { %s406_s15 = scalar_lea.hbm %s628_s1, 1024 }
  0x15   :  { %p407_p8 = scmp.ne.s32.totalorder %s628_s1, %s406_s15  ;;  %p410_p9 = scmp.lt.u32.totalorder %s406_s15, %s628_s1 }
  0x17   :  { %p412_p10 = pnand %p410_p9, %p407_p8 }
  0x19   :  { %415 = shalt.err (!%p412_p10)
}
  0x1a   :  { %s416_s20 = scalar_lea.vmem %s536_s24, 1024  ;;  %p421_p12 = scmp.lt.s32.totalorder %s536_s24, %s536_s24 }
  0x1b   :  { %p417_p11 = scmp.ne.s32.totalorder %s536_s24, %s416_s20  ;;  %p422_p13 = scmp.lt.s32.totalorder %s416_s20, %s416_s20 }
  0x1d   :  { %p423_p0 = por %p422_p13, %p421_p12 }
  0x1f   :  { %p424_p1 = pnand %p423_p0, %p417_p11 }
  0x21   :  { %427 = shalt.err (!%p424_p1)
}
  0x22   :  { %26 = dma.hbm_to_vmem [thread:$0]  %s628_s1, 1024, %s536_s24, [#allocation6], %s488_s9, %s488_s9, %s489_s10  }
  0x23   :  { %s490_s22 = smov [#allocation10]   ;;  %s428_s27 = scalar_lea.hbm %s631_s4, 512 }
  0x24   :  { %s46_s23 = sshll.u32 %s490_s22, 4  ;;  %p429_p2 = scmp.ne.s32.totalorder %s631_s4, %s428_s27  ;;  %s47_s23 = int_to_ptr.vmem [resolvable:$true] %s46_s23 }
  0x25   :  { %p432_p3 = scmp.lt.u32.totalorder %s428_s27, %s631_s4 }
  0x27   :  { %p434_p4 = pnand %p432_p3, %p429_p2 }
  0x29   :  { %437 = shalt.err (!%p434_p4)
}
  0x2a   :  { %s438_s8 = scalar_lea.vmem %s47_s23, 512  ;;  %p443_p6 = scmp.lt.s32.totalorder %s47_s23, %s47_s23 }
  0x2b   :  { %p439_p5 = scmp.ne.s32.totalorder %s47_s23, %s438_s8  ;;  %p444_p7 = scmp.lt.s32.totalorder %s438_s8, %s438_s8 }
  0x2d   :  { %p445_p8 = por %p444_p7, %p443_p6 }
  0x2f   :  { %p446_p9 = pnand %p445_p8, %p439_p5 }
  0x31   :  { %449 = shalt.err (!%p446_p9)
}
  0x32   :  { %52 = dma.hbm_to_vmem [thread:$0]  %s631_s4, 512, %s47_s23, [#allocation9], %s488_s9, %s488_s9, %s489_s10  }
  0x33   :  { %476 = dma.done.wait [#allocation6], 1024  }
  0x34   :  { %477 = vsyncadd [#allocation6], 4294966272 }
  0x35   :  { %478 = dma.done.wait [#allocation9], 1024  }
  0x36   :  { %479 = vsyncadd [#allocation9], 4294966272  ;;  %vm69_vm0 = vcmask 261120   ;;  %v491_v0 = vmov 0.0   ;;  %v64_v1 = vld [vmem:[#allocation8] sm:$0xff]  ;;  %v65_v2 = vld [vmem:[#allocation8 + $0x8] sm:$0xff] }
  0x37   :  { %70 = vst.msk [vmem:[#allocation2] sm:$0xff] %vm69_vm0, %v491_v0  ;;  %v66_v3 = vld [vmem:[#allocation8 + $0x10] sm:$0xff]  ;;  %v67_v4 = vld [vmem:[#allocation8 + $0x18] sm:$0xff]  ;;  %p304_p10 = scmp.le.s32.totalorder %s627_s0, 0 }
  0x38   :  { %v306_v5 = vld [vmem:[%s630_s3] ss:$0 sm:$0xff]  ;;  %s596_s4 = smov (!%p304_p10), 0  }
  0x39   :  { %301 = sbr.rel (%p304_p10) target bundleno = 771 (0x303), region = 54 }
  0x40 LB: > { %v344_v6 = vpack.c.bf16 %v65_v2, %v64_v1  ;;  %v492_v7 = vmov 0.0|0.0   ;;  %v347_v8 = vpack.c.bf16 %v67_v4, %v66_v3  ;;  %vm493_vm1 = vmmov 0   ;;  %v78_v10 = vld [vmem:[#allocation2] sm:$0xff]  ;;  %s495_s3 = smov 64   ;;  %s305_s9 = sshll.u32 %s484_s4, 3  ;;  %s484_s4 = sphi %s596_s4, %s75_s4  }
  0x41   : > { %343 = vmatprep.subr.bf16.mxu0 %v492_v7  ;;  %v494_v9 = vmov 0.0   ;;  %s80_s10 = scalar_lea.vmem [#allocation5], %s305_s9  ;;  %s496_s15 = smov 96  }
  0x42   : > { %345 = vmatpush3.bf16.msra.mxu0 %v344_v6  ;;  %329 = vmatprep.mubr.msk.f32.mxu0 %vm493_vm1, %v494_v9  ;;  %v81_v14 = vld [vmem:[%s80_s10] sm:$0xff]  ;;  %s497_s16 = smov 32   ;;  %s75_s4 = sadd.s32 1, %s484_s4  }
  0x43   : > { %346 = vmatprep.subr.bf16.mxu0 %v492_v7  ;;  %p74_p11 = scmp.ge.s32.totalorder %s75_s4, %s627_s0 }
  0x46   : > { %348 = vmatpush3.bf16.msra.mxu0 %v347_v8 }
  0x49   : > { %330 = vmatmul.mubr.msk.f32.vlgmr.msra.gmra.mrb[0].mxu0 %vm69_vm0, %v78_v10 }
 0x11c   : > { %v157_v11 = vpop.f32.mrb[0].mxu0 }
 0x11d   : > { %v158_v12 = vadd.f32 %v306_v5, %v157_v11  ;;  %v331_v13 = vpop.f32.mrb[1].mxu0 }
 0x11f   : > { %169 = vrot.lane.b32.xlu0 %v158_v12, %s495_s3  ;;  %v161_v15 = vadd.f32 %v158_v12, %v81_v14 }
 0x121   : > { %v308_v16 = vmul.f32 -1.442695, %v161_v15 }
 0x123   : > { %378 = vpow2.f32 %v308_v16 }
 0x12d   : > { %v379_v17 = vpop.eup %378 }
 0x12e   : > { %v165_v18 = vadd.f32 1.0, %v379_v17 }
 0x130   : > { %380 = vrcp.f32 %v165_v18 }
 0x13a   : > { %v381_v19 = vpop.eup %380 }
 0x13b   : > { %v179_v26 = vsub.f32 1.0, %v381_v19 }
 0x191   : > { %v170_v20 = vpop.permute.xlu0 %169 }
 0x192   : > { %v172_v21 = vmul.f32 %v381_v19, %v170_v20 }
 0x194   : > { %174 = vrot.lane.b32.xlu0 %v172_v21, %s495_s3 }
 0x206   : > { %v175_v22 = vpop.permute.xlu0 %174 }
 0x207   : > { %v177_v23 = vadd.f32 %v175_v22, %v81_v14 }
 0x209   : > { %382 = vtanh.f32 %v177_v23 }
 0x213   : > { %v383_v24 = vpop.eup %382 }
 0x214   : > { %181 = vrot.lane.b32.xlu1 %v383_v24, %s496_s15 }
 0x218   : > { %185 = vrot.lane.b32.xlu1 %v78_v10, %s497_s16 }
 0x286   : > { %v182_v25 = vpop.permute.xlu1 %181 }
 0x287   : > { %v184_v28 = vmul.f32 %v182_v25, %v179_v26 }
 0x28a   : > { %v186_v27 = vpop.permute.xlu1 %185 }
 0x28b   : > { %v188_v29 = vmul.f32 %v381_v19, %v186_v27 }
 0x28d   : > { %v189_v30 = vadd.f32 %v188_v29, %v184_v28 }
 0x28f   : > { %191 = vrot.lane.b32.xlu0 %v189_v30, %s496_s15 }
 0x2fc   :  { %77 = sbr.rel (!%p74_p11) target bundleno = 64 (0x40), region = 60 }
 0x301   : > { %v192_v31 = vpop.permute.xlu0 %191 }
 0x302   : > { %194 = vst.msk [vmem:[#allocation2] sm:$0xff] %vm69_vm0, %v192_v31 }
 0x303 PF:  { %v196_v32 = vld [vmem:[#allocation10] sm:$0xff]  ;;  %v197_v33 = vld [vmem:[#allocation10 + $0x8] sm:$0xff]  ;;  %v198_v34 = vld [vmem:[#allocation10 + $0x10] sm:$0xff]  ;;  %v498_v35 = vmov 0.0|0.0   ;;  %vm499_vm2 = vmmov 0   ;;  %s500_s0 = smov [#allocation11]  }
 0x304   :  { %349 = vmatprep.subr.bf16.mxu0 %v498_v35  ;;  %v350_v36 = vpack.c.bf16 %v197_v33, %v196_v32  ;;  %v199_v37 = vld [vmem:[#allocation10 + $0x18] sm:$0xff]  ;;  %340 = vmatprep.mubr.msk.f32.mxu0 %vm499_vm2, %v491_v0  ;;  %s287_s2 = sshll.u32 %s500_s0, 4  ;;  %s288_s2 = int_to_ptr.vmem [resolvable:$true] %s287_s2 }
 0x305   :  { %v353_v38 = vpack.c.bf16 %v199_v37, %v198_v34  ;;  %v309_v40 = vld [vmem:[%s632_s5] ss:$0 sm:$0xff]  ;;  %s450_s21 = scalar_lea.vmem %s288_s2, 128  ;;  %p455_p13 = scmp.lt.s32.totalorder %s288_s2, %s288_s2 }
 0x306   :  { %351 = vmatpush3.bf16.msra.mxu0 %v350_v36  ;;  %p451_p12 = scmp.ne.s32.totalorder %s288_s2, %s450_s21  ;;  %p456_p0 = scmp.lt.s32.totalorder %s450_s21, %s450_s21 }
 0x307   :  { %352 = vmatprep.subr.bf16.mxu0 %v498_v35 }
 0x308   :  { %p457_p1 = por %p456_p0, %p455_p13 }
 0x309   :  { %v195_v39 = vld [vmem:[#allocation2] sm:$0xff] }
 0x30a   :  { %354 = vmatpush3.bf16.msra.mxu0 %v353_v38  ;;  %p458_p2 = pnand %p457_p1, %p451_p12 }
 0x30d   :  { %341 = vmatmul.mubr.msk.f32.vlgmr.msra.gmra.mrb[0].mxu0 %vm69_vm0, %v195_v39 }
 0x3e0   :  { %v276_v41 = vpop.f32.mrb[0].mxu0 }
 0x3e1   :  { %v277_v42 = vadd.f32 %v309_v40, %v276_v41  ;;  %v342_v43 = vpop.f32.mrb[1].mxu0 }
 0x3e3   :  { %280 = vst [vmem:[#allocation11] sm:$0xff] %v277_v42 }
 0x3e4   :  { %461 = shalt.err (!%p458_p2)
}
 0x3e5   :  { %s462_s25 = scalar_lea.hbm %s633_s6, 128 }
 0x3e6   :  { %p463_p3 = scmp.ne.s32.totalorder %s633_s6, %s462_s25  ;;  %p466_p4 = scmp.lt.u32.totalorder %s462_s25, %s633_s6 }
 0x3e8   :  { %p468_p5 = pnand %p466_p4, %p463_p3 }
 0x3ea   :  { %471 = shalt.err (!%p468_p5)
}
 0x3eb   :  { %290 = dma.vmem_to_hbm [thread:$0]  %s288_s2, 128, %s633_s6, [#allocation7]  }
 0x3ec   :  { %480 = dma.done.wait [#allocation7], 128  }
 0x3ed   :  { %481 = vsyncadd [#allocation7], 4294967168 }
 0x3ee   :  { %294 = vsyncpa [#allocation6], 1 }
 0x3ef   :  { %295 = vsyncpa [#allocation9], 1 }
 0x3f0   :  { %296 = vsyncpa [#allocation7], 1 }

</bundles_post_ra>
